<compile_context>
chip_gen: v7x
topology: tpu7x:2x2x1
jax: 0.10.0
libtpu: 0.0.40
codegen_flags: <defaults>
</compile_context>

<pallas_src>
import functools

import jax
import jax.numpy as jnp
from jax import lax
from jax.experimental import pallas as pl
from jax.experimental.pallas import tpu as pltpu

F32 = jnp.float32
BF16 = jnp.bfloat16
OUT_PAD = 128     # lane-dense padding for the (N, 1) classifier output

ROW_TILE = 256    # attention source-row tile (v7x could prefer 128; see review)
COL_TILE = 512    # attention target-row tile (online-softmax reduction axis)
LIN_TILE = 512    # row tile for plain linear / mean kernels
ROW_ALIGN = 32    # int8 mask packs 4 rows/sublane -> keep sublane tiles legal
COL_ALIGN = 128   # lane-dense last dim


def _bf16(x):
    return x.astype(BF16)


def _round_up(x, m):
    return ((x + m - 1) // m) * m


def _tile_and_pad(n, pref_tile, align):
    """Pick a tile and the padded extent: cdiv-style grid with a padded last
    tile (no divisibility fallback to a single giant block)."""
    if n >= 2 * pref_tile:
        tile = pref_tile
    else:
        tile = _round_up(max(n, align), align)
    return tile, _round_up(n, tile)


def _pad_rows(x, n_pad):
    n = x.shape[0]
    if n == n_pad:
        return x
    return jnp.pad(x, ((0, n_pad - n),) + ((0, 0),) * (x.ndim - 1))


@functools.lru_cache(maxsize=None)
def _vmem_limit_bytes():
    # v7x: 64 MiB physical VMEM; v5e/v6e: 128 MiB.  Use <= 3/4 of physical
    # (never more than 96 MiB) so double-buffered streams + scratch always fit.
    try:
        cap = int(pltpu.get_tpu_info().vmem_capacity_bytes)
    except Exception:
        cap = 64 * 1024 * 1024
    return min(cap * 3 // 4, 96 * 1024 * 1024)


def _cparams(semantics):
    return pltpu.CompilerParams(dimension_semantics=semantics,
                                vmem_limit_bytes=_vmem_limit_bytes())


# ----------------------------- Pallas kernels -----------------------------

def _linear_kernel(x_ref, w_ref, b_ref, o_ref):
    # x:(T,Fin) f32, w:(Fin,Fout) bf16, b:(1,Fout) f32 -> (T,Fout) f32
    o_ref[...] = (jnp.dot(_bf16(x_ref[...]), w_ref[...],
                          preferred_element_type=F32) + b_ref[...])


def _src_score_kernel(src_ref, w_ref, b_ref, ws_ref, ab_ref, s_ref):
    # Source half of att([s;t]):  s_i = (x_i W + b).ws + att_b   -> (T,1)
    sp = (jnp.dot(_bf16(src_ref[...]), w_ref[...], preferred_element_type=F32)
          + b_ref[...])
    s_ref[...] = jnp.sum(sp * ws_ref[...], axis=1, keepdims=True) + ab_ref[...]


def _tgt_proj_kernel(tgt_ref, w_ref, b_ref, wt_ref, p_ref, trow_ref):
    # Hoisted target projection: computed ONCE per relation (not once per
    # attention grid step).  Also folds the att "target half":
    #   t_j = (x_j W + b).wt, emitted directly as a lane-dense (1, T) row so
    # the attention kernel never needs a transpose or a degenerate matmul.
    tp = (jnp.dot(_bf16(tgt_ref[...]), w_ref[...], preferred_element_type=F32)
          + b_ref[...])
    tp_bf = tp.astype(BF16)
    p_ref[...] = tp_bf
    trow_ref[...] = lax.dot_general(_bf16(wt_ref[...]), tp_bf,
                                    (((1,), (1,)), ((), ())),
                                    preferred_element_type=F32)


def _attn_kernel(counts_ref, s_ref, trow_ref, tgtp_ref, mask_ref, bias_ref,
                 o_ref, m_sc, l_sc, acc_sc):
    """GAT attention with online softmax over target tiles.

    grid = (src_row_tiles [parallel], tgt_col_tiles [arbitrary]); m/l/acc live
    in VMEM scratch; fully-masked tiles are skipped via scalar-prefetched
    per-tile edge counts.
    """
    i = pl.program_id(0)
    j = pl.program_id(1)
    n_j = pl.num_programs(1)

    @pl.when(j == 0)
    def _init():
        m_sc[...] = jnp.full_like(m_sc, -jnp.inf)
        l_sc[...] = jnp.zeros_like(l_sc)
        acc_sc[...] = jnp.zeros_like(acc_sc)

    @pl.when(counts_ref[i * n_j + j] > 0)        # skip fully-masked tiles
    def _tile():
        scores = jnp.tanh(s_ref[...] + trow_ref[...])          # (Ts,Tt) f32
        edge = mask_ref[...] > 0                                # int8 -> bool
        masked = jnp.where(edge, scores, jnp.float32(-1e30))
        m_new = jnp.maximum(m_sc[...], jnp.max(masked, axis=1, keepdims=True))
        alpha = jnp.exp(m_sc[...] - m_new)
        p = jnp.where(edge, jnp.exp(masked - m_new), 0.0)
        l_sc[...] = alpha * l_sc[...] + jnp.sum(p, axis=1, keepdims=True)
        acc_sc[...] = alpha * acc_sc[...] + jnp.dot(
            _bf16(p), tgtp_ref[...], preferred_element_type=F32)
        m_sc[...] = m_new

    @pl.when(j == n_j - 1)
    def _finalize():
        l = l_sc[...]
        inv = pl.reciprocal(jnp.where(l > 0.0, l, 1.0), approx=True)
        o_ref[...] = acc_sc[...] * inv + bias_ref[...]   # isolated rows -> bias


def _layernorm(h, g, b):
    mu = jnp.mean(h, axis=-1, keepdims=True)
    var = jnp.mean((h - mu) ** 2, axis=-1, keepdims=True)
    return (h - mu) * lax.rsqrt(var + 1e-5) * g + b


def _make_res_dnn_kernel(num_res, num_dnn):
    """Whole Res_DNN head (prepare -> residual DNN blocks -> classifier +
    Sigmoid) fused; all (hid,hid) weights stay resident in VMEM."""
    def kernel(*refs):
        o_ref = refs[-1]
        it = iter(refs[:-1])
        x = next(it)[...]
        wp, bp = next(it)[...], next(it)[...]
        h = jnp.dot(_bf16(x), wp, preferred_element_type=F32) + bp
        for _ in range(num_res):
            shortcut = h
            for _ in range(num_dnn):
                w, b = next(it)[...], next(it)[...]
                g, beta = next(it)[...], next(it)[...]
                h = jnp.tanh(jnp.dot(_bf16(h), w, preferred_element_type=F32) + b)
                h = _layernorm(h, g, beta)
            g, beta = next(it)[...], next(it)[...]
            h = _layernorm(jnp.tanh(shortcut + h), g, beta)
        wc, bc = next(it)[...], next(it)[...]
        z = jnp.dot(_bf16(h), wc, preferred_element_type=F32) + bc  # lane-padded
        # Sigmoid = EUP exp + approximate reciprocal (no un-approximated divide)
        o_ref[...] = pl.reciprocal(1.0 + jnp.exp(-z), approx=True)
    return kernel


def _make_mean_kernel(n):
    inv = 1.0 / float(n)
    def kernel(*refs):
        o_ref = refs[-1]
        acc = refs[0][...]
        for r in refs[1:-1]:
            acc = acc + r[...]
        o_ref[...] = acc * inv
    return kernel


# ----------------------------- kernel wrappers -----------------------------

def linear(x, w, b):
    n, fin = x.shape
    fout = w.shape[1]
    tile, n_pad = _tile_and_pad(n, LIN_TILE, 8)
    out = pl.pallas_call(
        _linear_kernel,
        out_shape=jax.ShapeDtypeStruct((n_pad, fout), F32),
        grid=(n_pad // tile,),
        in_specs=[pl.BlockSpec((tile, fin), lambda i: (i, 0)),
                  pl.BlockSpec((fin, fout), lambda i: (0, 0)),
                  pl.BlockSpec((1, fout), lambda i: (0, 0))],
        out_specs=pl.BlockSpec((tile, fout), lambda i: (i, 0)),
        compiler_params=_cparams(("parallel",)),
    )(_pad_rows(x, n_pad), w, b)
    return out[:n]


def gat_conv(p, source_h, target_h, edges):
    """GATConv.forward (dropout = identity): hoisted projections + target-axis
    tiled online-softmax attention with scalar-prefetched tile-skip metadata."""
    ns, hid = source_h.shape
    nt = target_h.shape[0]
    tile_s, ns_pad = _tile_and_pad(ns, ROW_TILE, ROW_ALIGN)
    tile_t, nt_pad = _tile_and_pad(nt, COL_TILE, COL_ALIGN)
    n_i, n_j = ns_pad // tile_s, nt_pad // tile_t

    # --- prologue A: per-source attention score column (Ns,1) ---------------
    s_col = pl.pallas_call(
        _src_score_kernel,
        out_shape=jax.ShapeDtypeStruct((ns_pad, 1), F32),
        grid=(n_i,),
        in_specs=[pl.BlockSpec((tile_s, hid), lambda i: (i, 0)),
                  pl.BlockSpec((hid, hid), lambda i: (0, 0)),
                  pl.BlockSpec((1, hid), lambda i: (0, 0)),
                  pl.BlockSpec((1, hid), lambda i: (0, 0)),
                  pl.BlockSpec((1, 1), lambda i: (0, 0))],
        out_specs=pl.BlockSpec((tile_s, 1), lambda i: (i, 0)),
        compiler_params=_cparams(("parallel",)),
    )(_pad_rows(source_h, ns_pad), p["feat"]["w"], p["feat"]["b"],
      p["att_w_src"], p["att_b"])

    # --- prologue B: hoisted target projection + per-target score row -------
    tgt_p, t_row = pl.pallas_call(
        _tgt_proj_kernel,
        out_shape=(jax.ShapeDtypeStruct((nt_pad, hid), BF16),
                   jax.ShapeDtypeStruct((1, nt_pad), F32)),
        grid=(n_j,),
        in_specs=[pl.BlockSpec((tile_t, hid), lambda j: (j, 0)),
                  pl.BlockSpec((hid, hid), lambda j: (0, 0)),
                  pl.BlockSpec((1, hid), lambda j: (0, 0)),
                  pl.BlockSpec((1, hid), lambda j: (0, 0))],
        out_specs=[pl.BlockSpec((tile_t, hid), lambda j: (j, 0)),
                   pl.BlockSpec((1, tile_t), lambda j: (0, j))],
        compiler_params=_cparams(("parallel",)),
    )(_pad_rows(target_h, nt_pad), p["feat"]["w"], p["feat"]["b"],
      p["att_w_tgt"])

    # --- dense int8 edge mask + flat per-tile edge counts (SMEM prefetch) ---
    # TODO(synk): for very large graphs replace the dense Ns x Nt mask scatter
    # with a scalar-prefetched CSR (per-row-tile column indices) driving a
    # gather-style DMA of only the needed target rows.
    src_idx, tgt_idx = edges[0], edges[1]
    mask = jnp.zeros((ns_pad, nt_pad), jnp.int8).at[src_idx, tgt_idx].set(1)
    counts = jnp.zeros((n_i * n_j,), jnp.int32).at[
        (src_idx // tile_s) * n_j + (tgt_idx // tile_t)].add(1)

    out = pl.pallas_call(
        _attn_kernel,
        out_shape=jax.ShapeDtypeStruct((ns_pad, hid), F32),
        grid_spec=pltpu.PrefetchScalarGridSpec(
            num_scalar_prefetch=1,
            grid=(n_i, n_j),
            in_specs=[
                pl.BlockSpec((tile_s, 1), lambda i, j, c: (i, 0)),      # s_col
                pl.BlockSpec((1, tile_t), lambda i, j, c: (0, j)),      # t_row
                pl.BlockSpec((tile_t, hid), lambda i, j, c: (j, 0)),    # tgt_p
                pl.BlockSpec((tile_s, tile_t), lambda i, j, c: (i, j)), # mask
                pl.BlockSpec((1, hid), lambda i, j, c: (0, 0)),         # bias
            ],
            out_specs=pl.BlockSpec((tile_s, hid), lambda i, j, c: (i, 0)),
            scratch_shapes=[pltpu.VMEM((tile_s, 1), F32),      # running max
                            pltpu.VMEM((tile_s, 1), F32),      # running denom
                            pltpu.VMEM((tile_s, hid), F32)]),  # running numer
        compiler_params=_cparams(("parallel", "arbitrary")),
    )(counts, s_col, t_row, tgt_p, mask, p["bias"])
    return out[:ns]


def res_dnn_sigmoid(p, x):
    """Res_DNN (+ final Sigmoid) fused; row-tiled grid, weights in VMEM."""
    num_res = len(p["layers"])
    num_dnn = len(p["layers"][0]["dnns"])
    args = [p["prepare"]["w"], p["prepare"]["b"]]
    for lp in p["layers"]:
        for dp in lp["dnns"]:
            args += [dp["w"], dp["b"], dp["gamma"], dp["beta"]]
        args += [lp["gamma"], lp["beta"]]
    args += [p["classifier"]["w"], p["classifier"]["b"]]

    n, hid = x.shape
    tile, n_pad = _tile_and_pad(n, 256, 8)
    w_specs = [pl.BlockSpec(a.shape, lambda i: (0, 0)) for a in args]
    out = pl.pallas_call(
        _make_res_dnn_kernel(num_res, num_dnn),
        out_shape=jax.ShapeDtypeStruct((n_pad, OUT_PAD), F32),
        grid=(n_pad // tile,),
        in_specs=[pl.BlockSpec((tile, hid), lambda i: (i, 0))] + w_specs,
        out_specs=pl.BlockSpec((tile, OUT_PAD), lambda i: (i, 0)),
        compiler_params=_cparams(("parallel",)),
    )(_pad_rows(x, n_pad), *args)
    return out[:n, :p["classifier"]["out_features"]]     # drop lane padding


def mean_stack(arr_list):
    # torch.mean(torch.stack(list, 0), 0) without materialising the stack.
    if len(arr_list) == 1:
        return arr_list[0]
    k = len(arr_list)
    n, hid = arr_list[0].shape
    tile, n_pad = _tile_and_pad(n, LIN_TILE, 8)
    out = pl.pallas_call(
        _make_mean_kernel(k),
        out_shape=jax.ShapeDtypeStruct((n_pad, hid), F32),
        grid=(n_pad // tile,),
        in_specs=[pl.BlockSpec((tile, hid), lambda i: (i, 0)) for _ in range(k)],
        out_specs=pl.BlockSpec((tile, hid), lambda i: (i, 0)),
        compiler_params=_cparams(("parallel",)),
    )(*[_pad_rows(a, n_pad) for a in arr_list])
    return out[:n]


# ----------------------------- parameter init -----------------------------

def _init_linear(key, fin, fout, scale=0.1):
    kw, kb = jax.random.split(key)
    return {
        "w": (jax.random.normal(kw, (fin, fout), F32) * scale).astype(BF16),
        "b": jax.random.normal(kb, (1, fout), F32) * scale,
    }


def _init_gat(key, hid):
    k1, k2, k3 = jax.random.split(key, 3)
    att_w = jax.random.normal(k2, (2 * hid, 1), F32) * 0.1   # Linear(2H, 1)
    return {
        "feat": _init_linear(k1, hid, hid),
        "att_w_src": att_w[:hid, 0].reshape(1, hid),          # f32 (VPU use)
        "att_w_tgt": att_w[hid:, 0].reshape(1, hid),
        "att_b": jax.random.normal(k3, (1, 1), F32) * 0.1,
        "bias": jnp.zeros((1, hid), F32),   # GATConv.reset_parameters -> 0
    }


def _init_dnn(key, fin, fout):
    p = _init_linear(key, fin, fout)
    p["gamma"] = jnp.ones((1, fout), F32)
    p["beta"] = jnp.zeros((1, fout), F32)
    return p


def _init_res_dnn_layer(key, hid, num_dnn):
    keys = jax.random.split(key, num_dnn)
    return {
        "dnns": [_init_dnn(k, hid, hid) for k in keys],
        "gamma": jnp.ones((1, hid), F32),
        "beta": jnp.zeros((1, hid), F32),
    }


def _init_res_dnn(key, fin, hid, fout, num_res, num_dnn):
    k1, k2, k3 = jax.random.split(key, 3)
    kw, kb = jax.random.split(k3)
    wc = jax.random.normal(kw, (hid, fout), F32) * 0.1
    bc = jax.random.normal(kb, (1, fout), F32) * 0.1
    # lane-dense classifier: widen the single output column to OUT_PAD lanes
    # (padding columns are zero and sliced off outside the kernel).
    wc_pad = jnp.zeros((hid, OUT_PAD), F32).at[:, :fout].set(wc).astype(BF16)
    bc_pad = jnp.zeros((1, OUT_PAD), F32).at[:, :fout].set(bc)
    return {
        "prepare": _init_linear(k1, fin, hid),
        "layers": [_init_res_dnn_layer(k, hid, num_dnn)
                   for k in jax.random.split(k2, num_res)],
        "classifier": {"w": wc_pad, "b": bc_pad, "out_features": fout},
    }


def init_rgat_params(key, node_type_to_feature_len, relation_list, hid,
                     num_res_dnn, each_res_dnn_num):
    k_node, k_gat, k_out = jax.random.split(key, 3)
    node_keys = jax.random.split(k_node, len(node_type_to_feature_len))
    gat_keys = jax.random.split(k_gat, len(relation_list))
    return {
        "node": {
            nt: _init_linear(nk, flen, hid)
            for (nt, flen), nk in zip(node_type_to_feature_len.items(), node_keys)
        },
        "gat": {rel: _init_gat(gk, hid) for rel, gk in zip(relation_list, gat_keys)},
        "out": _init_res_dnn(k_out, hid, hid, 1, num_res_dnn, each_res_dnn_num),
    }


# ----------------------------- RGAT forward -----------------------------

def _project_all_node_features(params, feature):
    """All per-node-type feat projections, batched: one pallas_call per node
    type with rows concatenated across hops (instead of one call per hop)."""
    per_type = {}
    for hop in sorted(feature.keys()):
        for nt, x in feature[hop].items():
            per_type.setdefault(nt, []).append((hop, x))
    proj = {hop: {} for hop in feature}
    for nt, items in per_type.items():
        xcat = (jnp.concatenate([x for _, x in items], axis=0)
                if len(items) > 1 else items[0][1])
        ycat = linear(xcat, params["node"][nt]["w"], params["node"][nt]["b"])
        off = 0
        for hop, x in items:
            m = x.shape[0]
            proj[hop][nt] = ycat[off:off + m]
            off += m
    return proj


def rgat_forward(params, sub_graph_data_dict):
    adj = sub_graph_data_dict["Adj"]
    feature = sub_graph_data_dict["Feature"]
    hop_num = len(adj.keys())

    proj = _project_all_node_features(params, feature)
    src_node_feature_dict = dict(proj[hop_num])

    for hop in range(hop_num - 1, -1, -1):
        src_lists = {nt: [proj[hop][nt]] for nt in proj[hop]}
        for rel, rd in adj[hop].items():
            head, tail = rd["Head_type"], rd["Tail_type"]
            edges = rd["Edges"]
            if edges.shape[1] > 0:
                h = gat_conv(params["gat"][rel], proj[hop][head],
                             src_node_feature_dict[tail], edges)
            else:
                h = jnp.zeros(proj[hop][head].shape, F32)
            src_lists.setdefault(head, []).append(h)
        src_node_feature_dict = {nt: mean_stack(v) for nt, v in src_lists.items()}

    target_node_type = list(src_node_feature_dict.keys())[0]
    h_prime = src_node_feature_dict[target_node_type]
    return res_dnn_sigmoid(params["out"], h_prime)


# ----------------------------- example / main -----------------------------

if __name__ == "__main__":
    key = jax.random.PRNGKey(0)
    hid = 128   # lane-dense hidden width (full 128-lane vregs)
    node_feat_len = {"user": 12, "item": 20}
    relations = ["buys", "similar"]

    k_params, k_data = jax.random.split(key)
    params = init_rgat_params(
        k_params, node_feat_len, relations, hid, num_res_dnn=2, each_res_dnn_num=2
    )

    # Synthetic hierarchical sub-graph (hop_num = 2).
    ks = jax.random.split(k_data, 6)
    feature = {
        2: {"user": jax.random.normal(ks[0], (7, 12), F32),
            "item": jax.random.normal(ks[1], (8, 20), F32)},
        1: {"user": jax.random.normal(ks[2], (6, 12), F32),
            "item": jax.random.normal(ks[3], (5, 20), F32)},
        0: {"user": jax.random.normal(ks[4], (4, 12), F32),
            "item": jax.random.normal(ks[5], (3, 20), F32)},
    }
    adj = {
        1: {
            "buys": {  # user(hop1) -> item(hop2)
                "Head_type": "user", "Tail_type": "item",
                "Edges": jnp.array(
                    [[0, 0, 1, 2, 3, 3, 4, 5, 5, 2],
                     [1, 3, 0, 2, 5, 7, 4, 6, 0, 1]], dtype=jnp.int32),
            },
            "similar": {  # item(hop1) -> item(hop2)
                "Head_type": "item", "Tail_type": "item",
                "Edges": jnp.array(
                    [[0, 1, 2, 3, 4, 0, 2, 4],
                     [0, 2, 4, 6, 7, 5, 1, 3]], dtype=jnp.int32),
            },
        },
        0: {
            "buys": {  # user(hop0) -> item(hop1 aggregate)
                "Head_type": "user", "Tail_type": "item",
                "Edges": jnp.array(
                    [[0, 1, 2, 3, 0, 2],
                     [0, 1, 2, 3, 4, 4]], dtype=jnp.int32),
            },
            "similar": {  # empty edge list -> zeros branch
                "Head_type": "item", "Tail_type": "item",
                "Edges": jnp.zeros((2, 0), dtype=jnp.int32),
            },
        },
    }
    sub_graph = {"Adj": adj, "Feature": feature}

    out = rgat_forward(params, sub_graph)
    out = jax.block_until_ready(out)
    assert out.shape == (4, 1)
    assert bool(jnp.all(jnp.isfinite(out)))
    print("KERNEL_OK")
</pallas_src>

<mosaic_0001>
module attributes {stable_mosaic.version = 11 : i64} {
  func.func @_linear_kernel(%arg0: i32, %arg1: memref<24x12xf32, #tpu.memory_space<vmem>>, %arg2: memref<12x128xbf16, #tpu.memory_space<vmem>>, %arg3: memref<1x128xf32, #tpu.memory_space<vmem>>, %arg4: memref<24x128xf32, #tpu.memory_space<vmem>>) attributes {dimension_semantics = [#tpu.dimension_semantics<parallel>], iteration_bounds = array<i64: 1>, scalar_prefetch = 0 : i64, scratch_operands = 0 : i64, tpu.core_type = #tpu.core_type<tc>, window_params = [{transform_indices = @transform_0, window_bounds = array<i64: 24, 12>}, {pipeline_mode = #tpu.pipeline_mode<synchronous>, transform_indices = @transform_1, window_bounds = array<i64: 12, 128>}, {pipeline_mode = #tpu.pipeline_mode<synchronous>, transform_indices = @transform_2, window_bounds = array<i64: 1, 128>}, {transform_indices = @transform_3, window_bounds = array<i64: 24, 128>}]} {
    %c0 = arith.constant 0 : index
    %c0_0 = arith.constant 0 : index
    %0 = vector.load %arg1[%c0, %c0_0] : memref<24x12xf32, #tpu.memory_space<vmem>>, vector<24x12xf32>
    %1 = arith.truncf %0 : vector<24x12xf32> to vector<24x12xbf16>
    %c0_1 = arith.constant 0 : index
    %c0_2 = arith.constant 0 : index
    %2 = vector.load %arg2[%c0_1, %c0_2] : memref<12x128xbf16, #tpu.memory_space<vmem>>, vector<12x128xbf16>
    %cst = arith.constant dense<0.000000e+00> : vector<24x128xf32>
    %3 = tpu.matmul %1, %2, %cst {dimension_numbers = #tpu.dot_dimension_numbers<[1], [0], [0], [1], [0, 0, 1, 1], [], []>} : vector<24x12xbf16>, vector<12x128xbf16>, vector<24x128xf32> -> vector<24x128xf32>
    %c0_3 = arith.constant 0 : index
    %c0_4 = arith.constant 0 : index
    %4 = vector.load %arg3[%c0_3, %c0_4] : memref<1x128xf32, #tpu.memory_space<vmem>>, vector<1x128xf32>
    %5 = vector.broadcast %4 : vector<1x128xf32> to vector<24x128xf32>
    %6 = arith.addf %3, %5 : vector<24x128xf32>
    %c0_5 = arith.constant 0 : index
    %c0_6 = arith.constant 0 : index
    %7 = vector.load %arg4[%c0_5, %c0_6] : memref<24x128xf32, #tpu.memory_space<vmem>>, vector<24x128xf32>
    tpu.vector_store %arg4[%c0_5, %c0_6], %6 {strides = array<i32>} : memref<24x128xf32, #tpu.memory_space<vmem>>, vector<24x128xf32>,
    return
  }
  func.func @transform_0(%arg0: i32) -> (i32, i32) {
    %c0_i32 = arith.constant 0 : i32
    %c0_i32_0 = arith.constant 0 : i32
    return %arg0, %c0_i32 : i32, i32
  }
  func.func @transform_1(%arg0: i32) -> (i32, i32) {
    %c0_i32 = arith.constant 0 : i32
    %c0_i32_0 = arith.constant 0 : i32
    %c0_i32_1 = arith.constant 0 : i32
    return %c0_i32, %c0_i32_0 : i32, i32
  }
  func.func @transform_2(%arg0: i32) -> (i32, i32) {
    %c0_i32 = arith.constant 0 : i32
    %c0_i32_0 = arith.constant 0 : i32
    %c0_i32_1 = arith.constant 0 : i32
    return %c0_i32, %c0_i32_0 : i32, i32
  }
  func.func @transform_3(%arg0: i32) -> (i32, i32) {
    %c0_i32 = arith.constant 0 : i32
    %c0_i32_0 = arith.constant 0 : i32
    return %arg0, %c0_i32 : i32, i32
  }
}

</mosaic_0001>

<bundles_post_ra>
// kernel: tpu_custom_call.1
= control target key start
LH: loop header
LB: loop body
LE: loop exit
PB: predicated region body
PF: predicated region fallthrough
CT: control target
= control target key end

     0   :  { %vm42_vm0 = vcmask 1045504   ;;  %vm35_vm1 = vcmask 97280   ;;  %s205_s0 = inlined_call_operand.vmem [shape: f32[24,12], index: 0, kind: input, shape index: {}]   ;;  %s206_s1 = inlined_call_operand.vmem [shape: bf16[12,128], index: 1, kind: input, shape index: {}]   ;;  %s207_s2 = inlined_call_operand.vmem [shape: f32[1,128], index: 2, kind: input, shape index: {}]   ;;  %s208_s3 = inlined_call_operand.hbm [shape: f32[24,128], index: 3, kind: output, shape index: {}]  }
   0x1   :  { %v130_v0 = vld [vmem:[%s206_s1] sm:$0x3f]   ;;  %v17_v2 = vld [vmem:[%s205_s0 + $0x8] sm:$0xff]  ;;  %v18_v3 = vld [vmem:[%s205_s0 + $0x10] sm:$0xff] }
   0x2   :  { %v16_v1 = vld [vmem:[%s205_s0] sm:$0xff]  ;;  %126 = vmatprep.subr.msk.bf16.mxu0 %vm42_vm0, %v130_v0  ;;  %v44_v4 = vsel %vm42_vm0, %v130_v0, 0  ;;  %v20_v6 = vpack.c.bf16 %v18_v3, %v18_v3 }
   0x3   :  { %v19_v5 = vpack.c.bf16 %v17_v2, %v16_v1 }
   0x4   :  { %8 = vsyncpa [#allocation3], 0  ;;  %121 = vmatpush3.bf16.msra.mxu0 %v44_v4  ;;  %v113_v7 = vld [vmem:[%s207_s2] ss:$0 sm:$0xff]  ;;  %s155_s21 = smov [#allocation2]  }
   0x5   :  { %122 = vmatprep.mubr.msk.bf16.mxu0 %vm35_vm1, %v19_v5  ;;  %s102_s22 = sshll.u32 %s155_s21, 4  ;;  %s103_s22 = int_to_ptr.vmem [resolvable:$true] %s102_s22 }
   0x6   :  { %s131_s0 = scalar_lea.vmem %s103_s22, 384  ;;  %p136_p1 = scmp.lt.s32.totalorder %s103_s22, %s103_s22 }
   0x7   :  { %123 = vmatmul.mubr.msk.bf16.vlgmr.msra.gmra.mrb[0].mxu0 %vm35_vm1, %v20_v6  ;;  %p132_p0 = scmp.ne.s32.totalorder %s103_s22, %s131_s0  ;;  %p137_p2 = scmp.lt.s32.totalorder %s131_s0, %s131_s0 }
   0x9   :  { %p138_p3 = por %p137_p2, %p136_p1 }
   0xb   :  { %p139_p4 = pnand %p138_p3, %p132_p0 }
  0xda   :  { %v124_v8 = vpop.f32.mrb[0].mxu0 }
  0xdb   :  { %v89_v9 = vadd.f32 %v124_v8, %v113_v7  ;;  %v80_v10 = vpop.f32.mrb[1].mxu0 }
  0xdc   :  { %v81_v11 = vadd.f32 %v113_v7, %v80_v10  ;;  %v125_v12 = vpop.f32.mrb[2].mxu0 }
  0xdd   :  { %96 = vst [vmem:[#allocation2 + $0x10] sm:$0xff] %v89_v9  ;;  %v83_v13 = vpop.f32.mrb[3].mxu0 }
  0xde   :  { %94 = vst [vmem:[#allocation2] sm:$0xff] %v81_v11  ;;  %v84_v14 = vadd.f32 %v113_v7, %v83_v13 }
  0xe0   :  { %95 = vst [vmem:[#allocation2 + $0x8] sm:$0xff] %v84_v14 }
  0xe1   :  { %142 = shalt.err (!%p139_p4)
}
  0xe2   :  { %s143_s24 = scalar_lea.hbm %s208_s3, 384 }
  0xe3   :  { %p144_p5 = scmp.ne.s32.totalorder %s208_s3, %s143_s24  ;;  %p147_p6 = scmp.lt.u32.totalorder %s143_s24, %s208_s3 }
  0xe5   :  { %p149_p7 = pnand %p147_p6, %p144_p5 }
  0xe7   :  { %152 = shalt.err (!%p149_p7)
}
  0xe8   :  { %s156_s29 = smov 128   ;;  %s157_s30 = smov 8  }
  0xe9   :  { %108 = dma.vmem_to_hbm [thread:$0]  %s103_s22, 384, %s208_s3, [#allocation3], %s156_s29, %s156_s29, %s157_s30  }
  0xea   :  { %153 = dma.done.wait [#allocation3], 384  }
  0xeb   :  { %154 = vsyncadd [#allocation3], 4294966912 }
  0xec   :  { %112 = vsyncpa [#allocation3], 1 }

</bundles_post_ra>
